<compile_context>
chip_gen: v6e
topology: v6e:2x2x1
jax: 0.10.0
libtpu: 0.0.40
codegen_flags: <defaults>
</compile_context>

<pallas_src>
import functools

import jax
import jax.numpy as jnp
from jax import lax
from jax.experimental import pallas as pl
from jax.experimental.pallas import tpu as pltpu


_TB_MAX = 1024  # rows per batch tile; tiny VMEM footprint (fits v5e/v6e/v7x)


def _round_up(x: int, m: int) -> int:
    return (x + m - 1) // m * m


def _fc_logsoftmax_kernel(x_ref, w_ref, b_ref, o_ref):
    # x_ref: (TB, F)   batch tile
    # w_ref: (C, F)    resident weight (PyTorch nn.Linear layout)
    # b_ref: (C, 1)    resident bias
    # o_ref: (C, TB)   transposed, lane-dense output tile
    x = x_ref[...]
    w = w_ref[...]

    # logits^T = w @ x^T  -> (C, TB); MXU matmul with f32 accumulation.
    logits = lax.dot_general(
        w, x,
        dimension_numbers=(((1,), (1,)), ((), ())),
        preferred_element_type=jnp.float32,
    ) + b_ref[...]

    # TODO(synk): nn.Dropout is identity at inference; training-mode dropout
    # (pltpu.prng_seed + prng_random_bits mask, scale 1/(1-p)) is not applied.

    # Numerically stable log_softmax over the class axis (axis 0 here).
    m = jnp.max(logits, axis=0, keepdims=True)                    # (1, TB)
    shifted = logits - m
    lse = jnp.log(jnp.sum(jnp.exp(shifted), axis=0, keepdims=True))
    o_ref[...] = (shifted - lse).astype(o_ref.dtype)


@jax.jit
def _fused_fc_logsoftmax(x, w, b):
    """x: (B, F) f32, w: (C, F) f32, b: (C,) or (C, 1) f32 -> (B, C) log-probs."""
    B, F = x.shape
    C = w.shape[0]
    b = b.reshape(C, 1)

    # Tile size: multiple of 128 (lane-dense output), capped at _TB_MAX.
    TB = min(_TB_MAX, _round_up(max(B, 1), 128))
    B_pad = _round_up(B, TB)
    if B_pad != B:
        x = jnp.pad(x, ((0, B_pad - B), (0, 0)))

    itemsize = 4
    cost = pl.CostEstimate(
        flops=2 * B_pad * F * C + 4 * B_pad * C,
        transcendentals=B_pad * C,
        bytes_accessed=(B_pad * F + C * F + C + C * B_pad) * itemsize,
    )

    out_t = pl.pallas_call(
        _fc_logsoftmax_kernel,
        out_shape=jax.ShapeDtypeStruct((C, B_pad), jnp.float32),
        grid_spec=pltpu.PrefetchScalarGridSpec(
            num_scalar_prefetch=0,
            grid=(B_pad // TB,),
            in_specs=[
                pl.BlockSpec((TB, F), lambda i: (i, 0)),   # x tile marches over batch
                pl.BlockSpec((C, F), lambda i: (0, 0)),    # weight resident in VMEM
                pl.BlockSpec((C, 1), lambda i: (0, 0)),    # bias resident in VMEM
            ],
            out_specs=pl.BlockSpec((C, TB), lambda i: (0, i)),
        ),
        compiler_params=pltpu.CompilerParams(
            dimension_semantics=("parallel",),
            vmem_limit_bytes=32 * 1024 * 1024,
        ),
        cost_estimate=cost,
    )(x, w, b)

    # Back to the module's (B, C) layout; drop batch padding.
    return out_t.T[:B]


def birnn_each_net_forward(x, w, b, filters):
    """Forward of BiRNNEachNet. Returns (log_probs (B, C), filters)."""
    log_probs = _fused_fc_logsoftmax(x, w, b)
    # `filters` is passed through untouched at the Python level so object
    # identity is preserved (it never enters jit).
    return log_probs, filters


def init_params(key, fc_len, num_class):
    # Deterministic init mimicking nn.Linear default (uniform +/- 1/sqrt(fan_in)).
    kw, kb = jax.random.split(key)
    bound = 1.0 / jnp.sqrt(jnp.float32(fc_len))
    # PyTorch weight layout (num_class, fc_len) is exactly what the kernel wants.
    w = jax.random.uniform(kw, (num_class, fc_len), jnp.float32, -bound, bound)
    b = jax.random.uniform(kb, (num_class,), jnp.float32, -bound, bound)
    return w, b


def _reference(x, w, b):
    return jax.nn.log_softmax(x @ w.T + b.reshape(1, -1), axis=1)


if __name__ == "__main__":
    key = jax.random.PRNGKey(0)
    k_x, k_p, k_f, k_x2 = jax.random.split(key, 4)

    emb_dim = 16
    fc_len = emb_dim * 2          # params['emb_dim'] * 2
    num_class = 8
    batch = 2

    x = jax.random.normal(k_x, (batch, fc_len), jnp.float32)
    w, b = init_params(k_p, fc_len, num_class)
    # `filters` is opaque and passed through unchanged by the module.
    filters = {"filters": jax.random.normal(k_f, (4, 4), jnp.float32)}

    log_probs, filters_out = birnn_each_net_forward(x, w, b, filters)
    jax.block_until_ready(log_probs)

    # Sanity check against pure-JAX reference (small batch, single tile).
    ref = _reference(x, w, b)
    assert log_probs.shape == (batch, num_class)
    assert jnp.allclose(log_probs, ref, atol=1e-5), "mismatch vs reference (small batch)"
    assert filters_out is filters

    # Second check: non-multiple-of-128 batch exercising padding + multi-step grid.
    batch2 = 2500
    x2 = jax.random.normal(k_x2, (batch2, fc_len), jnp.float32)
    log_probs2, _ = birnn_each_net_forward(x2, w, b, filters)
    jax.block_until_ready(log_probs2)
    ref2 = _reference(x2, w, b)
    assert log_probs2.shape == (batch2, num_class)
    assert jnp.allclose(log_probs2, ref2, atol=1e-5), "mismatch vs reference (large batch)"

    print("KERNEL_OK")
</pallas_src>

<mosaic_0001>
module attributes {stable_mosaic.version = 11 : i64} {
  func.func @_fc_logsoftmax_kernel(%arg0: i32, %arg1: memref<128x32xf32, #tpu.memory_space<vmem>>, %arg2: memref<8x32xf32, #tpu.memory_space<vmem>>, %arg3: memref<8x1xf32, #tpu.memory_space<vmem>>, %arg4: memref<8x128xf32, #tpu.memory_space<vmem>>) attributes {dimension_semantics = [#tpu.dimension_semantics<parallel>], iteration_bounds = array<i64: 1>, scalar_prefetch = 0 : i64, scratch_operands = 0 : i64, tpu.core_type = #tpu.core_type<tc>, window_params = [{transform_indices = @transform_0, window_bounds = array<i64: 128, 32>}, {pipeline_mode = #tpu.pipeline_mode<synchronous>, transform_indices = @transform_1, window_bounds = array<i64: 8, 32>}, {pipeline_mode = #tpu.pipeline_mode<synchronous>, transform_indices = @transform_2, window_bounds = array<i64: 8, 1>}, {transform_indices = @transform_3, window_bounds = array<i64: 8, 128>}]} {
    %c0 = arith.constant 0 : index
    %c0_0 = arith.constant 0 : index
    %0 = vector.load %arg1[%c0, %c0_0] : memref<128x32xf32, #tpu.memory_space<vmem>>, vector<128x32xf32>
    %c0_1 = arith.constant 0 : index
    %c0_2 = arith.constant 0 : index
    %1 = vector.load %arg2[%c0_1, %c0_2] : memref<8x32xf32, #tpu.memory_space<vmem>>, vector<8x32xf32>
    %cst = arith.constant dense<0.000000e+00> : vector<8x128xf32>
    %2 = tpu.matmul %1, %0, %cst {dimension_numbers = #tpu.dot_dimension_numbers<[1], [1], [0], [0], [0, 0, 1, 0], [], []>} : vector<8x32xf32>, vector<128x32xf32>, vector<8x128xf32> -> vector<8x128xf32>
    %c0_3 = arith.constant 0 : index
    %c0_4 = arith.constant 0 : index
    %3 = vector.load %arg3[%c0_3, %c0_4] : memref<8x1xf32, #tpu.memory_space<vmem>>, vector<8x1xf32>
    %4 = vector.broadcast %3 : vector<8x1xf32> to vector<8x128xf32>
    %5 = arith.addf %2, %4 : vector<8x128xf32>
    %cst_5 = arith.constant dense<0xFF800000> : vector<128xf32>
    %6 = vector.multi_reduction <maximumf>, %5, %cst_5 [0] : vector<8x128xf32> to vector<128xf32>
    %7 = vector.shape_cast %6 : vector<128xf32> to vector<1x128xf32>
    %8 = vector.broadcast %7 : vector<1x128xf32> to vector<8x128xf32>
    %9 = arith.subf %5, %8 : vector<8x128xf32>
    %10 = math.exp %9 : vector<8x128xf32>
    %cst_6 = arith.constant dense<0.000000e+00> : vector<128xf32>
    %11 = vector.multi_reduction <add>, %10, %cst_6 [0] : vector<8x128xf32> to vector<128xf32>
    %12 = vector.shape_cast %11 : vector<128xf32> to vector<1x128xf32>
    %13 = math.log %12 : vector<1x128xf32>
    %14 = vector.broadcast %13 : vector<1x128xf32> to vector<8x128xf32>
    %15 = arith.subf %9, %14 : vector<8x128xf32>
    %c0_7 = arith.constant 0 : index
    %c0_8 = arith.constant 0 : index
    %16 = vector.load %arg4[%c0_7, %c0_8] : memref<8x128xf32, #tpu.memory_space<vmem>>, vector<8x128xf32>
    tpu.vector_store %arg4[%c0_7, %c0_8], %15 {strides = array<i32>} : memref<8x128xf32, #tpu.memory_space<vmem>>, vector<8x128xf32>,
    return
  }
  func.func @transform_0(%arg0: i32) -> (i32, i32) {
    %c0_i32 = arith.constant 0 : i32
    %c0_i32_0 = arith.constant 0 : i32
    return %arg0, %c0_i32 : i32, i32
  }
  func.func @transform_1(%arg0: i32) -> (i32, i32) {
    %c0_i32 = arith.constant 0 : i32
    %c0_i32_0 = arith.constant 0 : i32
    %c0_i32_1 = arith.constant 0 : i32
    return %c0_i32, %c0_i32_0 : i32, i32
  }
  func.func @transform_2(%arg0: i32) -> (i32, i32) {
    %c0_i32 = arith.constant 0 : i32
    %c0_i32_0 = arith.constant 0 : i32
    %c0_i32_1 = arith.constant 0 : i32
    return %c0_i32, %c0_i32_0 : i32, i32
  }
  func.func @transform_3(%arg0: i32) -> (i32, i32) {
    %c0_i32 = arith.constant 0 : i32
    %c0_i32_0 = arith.constant 0 : i32
    return %c0_i32, %arg0 : i32, i32
  }
}

</mosaic_0001>

<bundles_post_ra>
// kernel: _fused_fc_logsoftmax.1
= control target key start
LH: loop header
LB: loop body
LE: loop exit
PB: predicated region body
PF: predicated region fallthrough
CT: control target
= control target key end

     0   :  { %vm37_vm0 = vcmask 261120   ;;  %v259_v0 = vmov 0.0   ;;  %vm260_vm1 = vmmov 0   ;;  %v261_v2 = vmov 0   ;;  %s356_s0 = inlined_call_operand.vmem [shape: f32[128,32], index: 0, kind: input, shape index: {}]   ;;  %s357_s2 = inlined_call_operand.vmem [shape: f32[8,1], index: 2, kind: input, shape index: {}]   ;;  %s358_s1 = inlined_call_operand.vmem [shape: f32[8,32], index: 1, kind: input, shape index: {}]   ;;  %s359_s3 = inlined_call_operand.vmem [shape: f32[8,128], index: 3, kind: output, shape index: {}]  }
   0x1   :  { %216 = vmatprep.subr.mxu0 %v259_v0  ;;  %v29_v1 = vld [vmem:[%s356_s0 + $0x78] sm:$0xff]  ;;  %248 = vmatprep.mubr.msk.f32.mxu0 %vm260_vm1, %v259_v0  ;;  %v28_v3 = vld [vmem:[%s356_s0 + $0x70] sm:$0xff]  ;;  %v31_v4 = vld [vmem:[%s357_s2] sm:$0xff] }
   0x2   :  { %217 = vmatpush3.xpose.msk.msra.mxu0 %vm37_vm0, %v29_v1  ;;  %254 = vset.pattern.permute.xlu0 %v261_v2  ;;  %v27_v5 = vld [vmem:[%s356_s0 + $0x68] sm:$0xff]  ;;  %v26_v6 = vld [vmem:[%s356_s0 + $0x60] sm:$0xff]  ;;  %v25_v7 = vld [vmem:[%s356_s0 + $0x58] sm:$0xff] }
   0x3   :  { %218 = vmatprep.subr.mxu0 %v259_v0  ;;  %34 = vperm.xlu0 %254, %v31_v4   ;;  %v24_v8 = vld [vmem:[%s356_s0 + $0x50] sm:$0xff]  ;;  %v23_v9 = vld [vmem:[%s356_s0 + $0x48] sm:$0xff]  ;;  %v22_v10 = vld [vmem:[%s356_s0 + $0x40] sm:$0xff] }
   0x4   :  { %v21_v11 = vld [vmem:[%s356_s0 + $0x38] sm:$0xff]  ;;  %v20_v12 = vld [vmem:[%s356_s0 + $0x30] sm:$0xff]  ;;  %v19_v13 = vld [vmem:[%s356_s0 + $0x28] sm:$0xff] }
   0x5   :  { %v18_v14 = vld [vmem:[%s356_s0 + $0x20] sm:$0xff]  ;;  %v17_v15 = vld [vmem:[%s356_s0 + $0x18] sm:$0xff]  ;;  %v16_v16 = vld [vmem:[%s356_s0 + $0x10] sm:$0xff] }
   0x6   :  { %219 = vmatpush3.xpose.msk.msra.mxu0 %vm37_vm0, %v28_v3  ;;  %v15_v17 = vld [vmem:[%s356_s0 + $0x8] sm:$0xff]  ;;  %v14_v18 = vld [vmem:[%s356_s0] sm:$0xff] }
   0x7   :  { %220 = vmatprep.subr.mxu0 %v259_v0  ;;  %v30_v19 = vld [vmem:[%s358_s1] sm:$0xff] }
   0xa   :  { %221 = vmatpush3.xpose.msk.msra.mxu0 %vm37_vm0, %v27_v5 }
   0xb   :  { %222 = vmatprep.subr.mxu0 %v259_v0 }
   0xe   :  { %223 = vmatpush3.xpose.msk.msra.mxu0 %vm37_vm0, %v26_v6 }
   0xf   :  { %224 = vmatprep.subr.mxu0 %v259_v0 }
  0x12   :  { %225 = vmatpush3.xpose.msk.msra.mxu0 %vm37_vm0, %v25_v7 }
  0x13   :  { %226 = vmatprep.subr.mxu0 %v259_v0 }
  0x16   :  { %227 = vmatpush3.xpose.msk.msra.mxu0 %vm37_vm0, %v24_v8 }
  0x17   :  { %228 = vmatprep.subr.mxu0 %v259_v0 }
  0x1a   :  { %229 = vmatpush3.xpose.msk.msra.mxu0 %vm37_vm0, %v23_v9 }
  0x1b   :  { %230 = vmatprep.subr.mxu0 %v259_v0 }
  0x1e   :  { %231 = vmatpush3.xpose.msk.msra.mxu0 %vm37_vm0, %v22_v10 }
  0x1f   :  { %232 = vmatprep.subr.mxu0 %v259_v0 }
  0x22   :  { %233 = vmatpush3.xpose.msk.msra.mxu0 %vm37_vm0, %v21_v11 }
  0x23   :  { %234 = vmatprep.subr.mxu0 %v259_v0 }
  0x26   :  { %235 = vmatpush3.xpose.msk.msra.mxu0 %vm37_vm0, %v20_v12 }
  0x27   :  { %236 = vmatprep.subr.mxu0 %v259_v0 }
  0x2a   :  { %237 = vmatpush3.xpose.msk.msra.mxu0 %vm37_vm0, %v19_v13 }
  0x2b   :  { %238 = vmatprep.subr.mxu0 %v259_v0 }
  0x2e   :  { %239 = vmatpush3.xpose.msk.msra.mxu0 %vm37_vm0, %v18_v14 }
  0x2f   :  { %240 = vmatprep.subr.mxu0 %v259_v0 }
  0x32   :  { %241 = vmatpush3.xpose.msk.msra.mxu0 %vm37_vm0, %v17_v15 }
  0x33   :  { %242 = vmatprep.subr.mxu0 %v259_v0 }
  0x36   :  { %243 = vmatpush3.xpose.msk.msra.mxu0 %vm37_vm0, %v16_v16 }
  0x37   :  { %244 = vmatprep.subr.mxu0 %v259_v0 }
  0x3a   :  { %245 = vmatpush3.xpose.msk.msra.mxu0 %vm37_vm0, %v15_v17 }
  0x3b   :  { %246 = vmatprep.subr.mxu0 %v259_v0 }
  0x3e   :  { %247 = vmatpush3.xpose.msk.msra.mxu0 %vm37_vm0, %v14_v18 }
  0x41   :  { %249 = vmatmul.mubr.msk.f32.vlgmr.msra.gmra.mxu0 %vm37_vm0, %v30_v19 }
  0x7e   :  { %v35_v20 = vpop.permute.xlu0 %34 }
 0x101   :  { %v155_v21 = vpop.f32.mrf.mxu0 }
 0x102   :  { %v156_v22 = vadd.f32 %v155_v21, %v35_v20 }
 0x103   :  { %v250_v23 = vpop.f32.mrf.mxu0 }
 0x104   :  { %v159_v24 = vrot.slane %v156_v22, 4 }
 0x106   :  { %v160_v25 = vmax.f32 %v156_v22, %v159_v24 }
 0x108   :  { %v161_v26 = vrot.slane %v160_v25, 2 }
 0x10a   :  { %v162_v27 = vmax.f32 %v160_v25, %v161_v26 }
 0x10c   :  { %v163_v28 = vrot.slane %v162_v27, 1 }
 0x10e   :  { %v164_v29 = vmax.f32 %v162_v27, %v163_v28 }
 0x110   :  { %v165_v30 = vsub.f32 %v156_v22, %v164_v29 }
 0x112   :  { %v166_v31 = vmul.f32 1.442695, %v165_v30 }
 0x114   :  { %255 = vpow2.f32 %v166_v31 }
 0x121   :  { %v256_v32 = vpop.eup %255 }
 0x122   :  { %v168_v33 = vrot.slane %v256_v32, 4 }
 0x124   :  { %v169_v34 = vadd.f32 %v256_v32, %v168_v33 }
 0x126   :  { %v170_v35 = vrot.slane %v169_v34, 2 }
 0x128   :  { %v171_v36 = vadd.f32 %v170_v35, %v169_v34 }
 0x12a   :  { %v172_v37 = vrot.slane %v171_v36, 1 }
 0x12c   :  { %v173_v38 = vadd.f32 %v172_v37, %v171_v36 }
 0x12e   :  { %257 = vlog2.f32 %v173_v38 }
 0x13b   :  { %v258_v39 = vpop.eup %257 }
 0x13c   :  { %v175_v40 = vmul.f32 0.6931472, %v258_v39 }
 0x13e   :  { %v176_v41 = vsub.f32 %v165_v30, %v175_v40 }
 0x140   :  { %177 = vst [vmem:[%s359_s3] sm:$0xff] %v176_v41 }

</bundles_post_ra>
